<compile_context>
chip_gen: v7x
topology: tpu7x:2x2x1
jax: 0.10.0
libtpu: 0.0.40
codegen_flags: <defaults>
</compile_context>

<pallas_src>
import functools

import jax
import jax.numpy as jnp
from jax import lax
from jax.experimental import pallas as pl
from jax.experimental.pallas import tpu as pltpu


def _residual_dwconv_bn_kernel(x_ref, w_ref, b_ref, o_ref, *, H, C):
    # x_ref : (R, W*C)  R = images_per_block * H   (lane-dense, channels-last flat)
    # w_ref : (9, W*C)  folded depthwise weights, row = 3*ky + kx, tiled along W
    # b_ref : (1, W*C)  folded bias, tiled along W
    # o_ref : (R, W*C)
    R, WC = x_ref.shape
    x = x_ref[...].astype(jnp.float32)
    w = w_ref[...].astype(jnp.float32)
    b = b_ref[...].astype(jnp.float32)

    # ---- W (column) shifts: lane rolls by C, wrapped lanes zeroed at image edges.
    col = lax.broadcasted_iota(jnp.int32, (R, WC), 1)
    # xl[h, w] = x[h, w-1]  (zero at w == 0  -> first C lanes)
    xl = jnp.where(col >= C, pltpu.roll(x, shift=C, axis=1), 0.0)
    # xr[h, w] = x[h, w+1]  (zero at w == W-1 -> last C lanes)
    xr = jnp.where(col < WC - C, pltpu.roll(x, shift=WC - C, axis=1), 0.0)

    # ---- per-kernel-row sums; residual + bias folded into the centre row (no zero init).
    top = xl * w[0:1, :] + x * w[1:2, :] + xr * w[2:3, :]          # ky = 0
    mid = x + b + xl * w[3:4, :] + x * w[4:5, :] + xr * w[5:6, :]  # ky = 1 (+ residual, bias)
    bot = xl * w[6:7, :] + x * w[7:8, :] + xr * w[8:9, :]          # ky = 2

    # ---- H (row) shifts: sublane rolls by 1, wrapped / cross-image rows masked out.
    row = lax.broadcasted_iota(jnp.int32, (R, WC), 0)
    h_in_img = row % H
    # out[h] += top[h-1]  (invalid at h == 0 of each image)
    top_sh = jnp.where(h_in_img > 0, pltpu.roll(top, shift=1, axis=0), 0.0)
    # out[h] += bot[h+1]  (invalid at h == H-1 of each image)
    bot_sh = jnp.where(h_in_img < H - 1, pltpu.roll(bot, shift=R - 1, axis=0), 0.0)

    o_ref[...] = (mid + top_sh + bot_sh).astype(o_ref.dtype)


def residual_dwconv_bn(x_nhwc, w_folded, b_folded, *, vmem_block_budget=8 * 1024 * 1024):
    """x_nhwc: (N, H, W, C); w_folded: (3, 3, C); b_folded: (C,)."""
    N, H, W, C = x_nhwc.shape
    WC = W * C

    # Free reshape: (N, H, W, C) -> (N*H, W*C); lane dim becomes W*C (lane-dense).
    x2 = x_nhwc.reshape(N * H, WC)

    # Tile whole images per grid step; largest divisor of N whose block stays under
    # the VMEM budget (x~4 for in+out double buffering).  Toy shapes -> grid=(1,).
    # TODO(synk): intra-image row tiling with halo rows for very large feature maps
    # that don't fit a single-image block on v7x (64 MiB VMEM).
    bytes_per_img = H * WC * jnp.dtype(x_nhwc.dtype).itemsize
    max_ipb = max(1, int(vmem_block_budget // (4 * bytes_per_img)))
    ipb = 1
    for d in range(1, N + 1):
        if N % d == 0 and d <= max_ipb:
            ipb = d
    R = ipb * H
    grid = (N // ipb,)

    # Fold per-channel weights/bias into lane-dense (tiled along W) parameter slabs.
    w_flat = jnp.tile(w_folded.reshape(9, 1, C), (1, W, 1)).reshape(9, WC)
    b_flat = jnp.tile(b_folded.reshape(1, 1, C), (1, W, 1)).reshape(1, WC)

    kernel = functools.partial(_residual_dwconv_bn_kernel, H=H, C=C)

    out2 = pl.pallas_call(
        kernel,
        out_shape=jax.ShapeDtypeStruct((N * H, WC), x_nhwc.dtype),
        grid_spec=pltpu.PrefetchScalarGridSpec(
            num_scalar_prefetch=0,
            grid=grid,
            in_specs=[
                pl.BlockSpec((R, WC), lambda i: (i, 0)),
                pl.BlockSpec((9, WC), lambda i: (0, 0)),
                pl.BlockSpec((1, WC), lambda i: (0, 0)),
            ],
            out_specs=pl.BlockSpec((R, WC), lambda i: (i, 0)),
        ),
        compiler_params=pltpu.CompilerParams(
            dimension_semantics=("parallel",),
            vmem_limit_bytes=32 * 1024 * 1024,
        ),
    )(x2, w_flat, b_flat)

    return out2.reshape(N, H, W, C)


def _reference(x_nhwc, w_folded, b_folded):
    # Pure-JAX reference: depthwise 3x3 conv (folded BN) + residual.
    C = x_nhwc.shape[-1]
    w_hwio = w_folded.reshape(3, 3, 1, C)  # HWIO with feature_group_count=C
    y = lax.conv_general_dilated(
        x_nhwc, w_hwio, window_strides=(1, 1), padding=((1, 1), (1, 1)),
        dimension_numbers=("NHWC", "HWIO", "NHWC"), feature_group_count=C)
    return x_nhwc + y + b_folded.reshape(1, 1, 1, C)


if __name__ == "__main__":
    key = jax.random.PRNGKey(0)
    kx, kw, km, kv = jax.random.split(key, 4)

    # Small shapes consistent with Residual(Conv2d_BN(dim, dim, 3, 1, 1, groups=dim))
    N, C, H, W = 2, 4, 16, 16

    # Input in PyTorch NCHW, transpose to NHWC for the kernel (glue only).
    x_nchw = jax.random.normal(kx, (N, C, H, W), dtype=jnp.float32)
    x_nhwc = jnp.transpose(x_nchw, (0, 2, 3, 1))

    # Depthwise conv weight: PyTorch shape (C, 1, 3, 3) -> (3, 3, C)
    w_pt = jax.random.normal(kw, (C, 1, 3, 3), dtype=jnp.float32) * 0.1
    w_dw = jnp.transpose(w_pt[:, 0, :, :], (1, 2, 0))  # (3, 3, C)

    # BatchNorm2d params: gamma=1 (bn_weight_init=1), beta=0, synthetic running stats.
    eps = 1e-5
    gamma = jnp.ones((C,), dtype=jnp.float32)
    beta = jnp.zeros((C,), dtype=jnp.float32)
    running_mean = jax.random.normal(km, (C,), dtype=jnp.float32) * 0.05
    running_var = jnp.abs(jax.random.normal(kv, (C,), dtype=jnp.float32)) * 0.1 + 1.0

    scale = gamma / jnp.sqrt(running_var + eps)
    w_folded = w_dw * scale[None, None, :]
    b_folded = beta - running_mean * scale

    # TODO(synk): training-mode stochastic depth (per-sample drop mask) not implemented;
    # eval-mode forward (x + m(x)) is what is reproduced here.

    out = residual_dwconv_bn(x_nhwc, w_folded, b_folded)
    out = jax.block_until_ready(out)

    ref = _reference(x_nhwc, w_folded, b_folded)
    assert jnp.allclose(out, ref, atol=1e-5, rtol=1e-5), "mismatch vs reference"

    # Back to NCHW to match PyTorch output convention (glue only).
    out_nchw = jnp.transpose(out, (0, 3, 1, 2))
    jax.block_until_ready(out_nchw)
    print("KERNEL_OK")
</pallas_src>

<mosaic_0001>
module attributes {stable_mosaic.version = 11 : i64} {
  func.func @_residual_dwconv_bn_kernel(%arg0: i32, %arg1: memref<32x64xf32, #tpu.memory_space<vmem>>, %arg2: memref<9x64xf32, #tpu.memory_space<vmem>>, %arg3: memref<1x64xf32, #tpu.memory_space<vmem>>, %arg4: memref<32x64xf32, #tpu.memory_space<vmem>>) attributes {dimension_semantics = [#tpu.dimension_semantics<parallel>], iteration_bounds = array<i64: 1>, scalar_prefetch = 0 : i64, scratch_operands = 0 : i64, tpu.core_type = #tpu.core_type<tc>, window_params = [{transform_indices = @transform_0, window_bounds = array<i64: 32, 64>}, {pipeline_mode = #tpu.pipeline_mode<synchronous>, transform_indices = @transform_1, window_bounds = array<i64: 9, 64>}, {pipeline_mode = #tpu.pipeline_mode<synchronous>, transform_indices = @transform_2, window_bounds = array<i64: 1, 64>}, {transform_indices = @transform_3, window_bounds = array<i64: 32, 64>}]} {
    %c0 = arith.constant 0 : index
    %c0_0 = arith.constant 0 : index
    %0 = vector.load %arg1[%c0, %c0_0] : memref<32x64xf32, #tpu.memory_space<vmem>>, vector<32x64xf32>
    %c0_1 = arith.constant 0 : index
    %c0_2 = arith.constant 0 : index
    %1 = vector.load %arg2[%c0_1, %c0_2] : memref<9x64xf32, #tpu.memory_space<vmem>>, vector<9x64xf32>
    %c0_3 = arith.constant 0 : index
    %c0_4 = arith.constant 0 : index
    %2 = vector.load %arg3[%c0_3, %c0_4] : memref<1x64xf32, #tpu.memory_space<vmem>>, vector<1x64xf32>
    %3 = tpu.iota {dimensions = array<i32: 1>} : vector<32x64xi32>
    %c4_i32 = arith.constant 4 : i32
    %4 = vector.broadcast %c4_i32 : i32 to vector<32x64xi32>
    %5 = arith.cmpi sge, %3, %4 : vector<32x64xi32>
    %c4_i32_5 = arith.constant 4 : i32
    %6 = tpu.dynamic_rotate %0 by %c4_i32_5 dim 1 : vector<32x64xf32>, i32 -> vector<32x64xf32>
    %cst = arith.constant 0.000000e+00 : f32
    %7 = vector.broadcast %cst : f32 to vector<32x64xf32>
    %8 = arith.select %5, %6, %7 : vector<32x64xi1>, vector<32x64xf32>
    %c60_i32 = arith.constant 60 : i32
    %9 = vector.broadcast %c60_i32 : i32 to vector<32x64xi32>
    %10 = arith.cmpi slt, %3, %9 : vector<32x64xi32>
    %c60_i32_6 = arith.constant 60 : i32
    %11 = tpu.dynamic_rotate %0 by %c60_i32_6 dim 1 : vector<32x64xf32>, i32 -> vector<32x64xf32>
    %cst_7 = arith.constant 0.000000e+00 : f32
    %12 = vector.broadcast %cst_7 : f32 to vector<32x64xf32>
    %13 = arith.select %10, %11, %12 : vector<32x64xi1>, vector<32x64xf32>
    %14 = vector.extract_strided_slice %1 {offsets = [0, 0], sizes = [1, 64], strides = [1, 1]} : vector<9x64xf32> to vector<1x64xf32>
    %15 = vector.broadcast %14 : vector<1x64xf32> to vector<32x64xf32>
    %16 = arith.mulf %8, %15 : vector<32x64xf32>
    %17 = vector.extract_strided_slice %1 {offsets = [1, 0], sizes = [1, 64], strides = [1, 1]} : vector<9x64xf32> to vector<1x64xf32>
    %18 = vector.broadcast %17 : vector<1x64xf32> to vector<32x64xf32>
    %19 = arith.mulf %0, %18 : vector<32x64xf32>
    %20 = arith.addf %16, %19 : vector<32x64xf32>
    %21 = vector.extract_strided_slice %1 {offsets = [2, 0], sizes = [1, 64], strides = [1, 1]} : vector<9x64xf32> to vector<1x64xf32>
    %22 = vector.broadcast %21 : vector<1x64xf32> to vector<32x64xf32>
    %23 = arith.mulf %13, %22 : vector<32x64xf32>
    %24 = arith.addf %20, %23 : vector<32x64xf32>
    %25 = vector.broadcast %2 : vector<1x64xf32> to vector<32x64xf32>
    %26 = arith.addf %0, %25 : vector<32x64xf32>
    %27 = vector.extract_strided_slice %1 {offsets = [3, 0], sizes = [1, 64], strides = [1, 1]} : vector<9x64xf32> to vector<1x64xf32>
    %28 = vector.broadcast %27 : vector<1x64xf32> to vector<32x64xf32>
    %29 = arith.mulf %8, %28 : vector<32x64xf32>
    %30 = arith.addf %26, %29 : vector<32x64xf32>
    %31 = vector.extract_strided_slice %1 {offsets = [4, 0], sizes = [1, 64], strides = [1, 1]} : vector<9x64xf32> to vector<1x64xf32>
    %32 = vector.broadcast %31 : vector<1x64xf32> to vector<32x64xf32>
    %33 = arith.mulf %0, %32 : vector<32x64xf32>
    %34 = arith.addf %30, %33 : vector<32x64xf32>
    %35 = vector.extract_strided_slice %1 {offsets = [5, 0], sizes = [1, 64], strides = [1, 1]} : vector<9x64xf32> to vector<1x64xf32>
    %36 = vector.broadcast %35 : vector<1x64xf32> to vector<32x64xf32>
    %37 = arith.mulf %13, %36 : vector<32x64xf32>
    %38 = arith.addf %34, %37 : vector<32x64xf32>
    %39 = vector.extract_strided_slice %1 {offsets = [6, 0], sizes = [1, 64], strides = [1, 1]} : vector<9x64xf32> to vector<1x64xf32>
    %40 = vector.broadcast %39 : vector<1x64xf32> to vector<32x64xf32>
    %41 = arith.mulf %8, %40 : vector<32x64xf32>
    %42 = vector.extract_strided_slice %1 {offsets = [7, 0], sizes = [1, 64], strides = [1, 1]} : vector<9x64xf32> to vector<1x64xf32>
    %43 = vector.broadcast %42 : vector<1x64xf32> to vector<32x64xf32>
    %44 = arith.mulf %0, %43 : vector<32x64xf32>
    %45 = arith.addf %41, %44 : vector<32x64xf32>
    %46 = vector.extract_strided_slice %1 {offsets = [8, 0], sizes = [1, 64], strides = [1, 1]} : vector<9x64xf32> to vector<1x64xf32>
    %47 = vector.broadcast %46 : vector<1x64xf32> to vector<32x64xf32>
    %48 = arith.mulf %13, %47 : vector<32x64xf32>
    %49 = arith.addf %45, %48 : vector<32x64xf32>
    %50 = tpu.iota {dimensions = array<i32: 0>} : vector<32x64xi32>
    %c16_i32 = arith.constant 16 : i32
    %c0_i32 = arith.constant 0 : i32
    %51 = arith.cmpi eq, %c16_i32, %c0_i32 : i32
    %c1_i32 = arith.constant 1 : i32
    %52 = arith.select %51, %c1_i32, %c16_i32 : i32
    %53 = vector.broadcast %52 : i32 to vector<32x64xi32>
    %54 = arith.remsi %50, %53 : vector<32x64xi32>
    %c0_i32_8 = arith.constant 0 : i32
    %55 = vector.broadcast %c0_i32_8 : i32 to vector<32x64xi32>
    %56 = arith.cmpi ne, %54, %55 : vector<32x64xi32>
    %c0_i32_9 = arith.constant 0 : i32
    %57 = vector.broadcast %c0_i32_9 : i32 to vector<32x64xi32>
    %58 = arith.cmpi slt, %54, %57 : vector<32x64xi32>
    %c0_i32_10 = arith.constant 0 : i32
    %59 = arith.cmpi slt, %52, %c0_i32_10 : i32
    %60 = vector.broadcast %59 : i1 to vector<32x64xi1>
    %61 = vector.broadcast %60 : vector<32x64xi1> to vector<32x64xi1>
    %62 = arith.xori %58, %61 : vector<32x64xi1>
    %63 = arith.andi %62, %56 : vector<32x64xi1>
    %64 = vector.broadcast %52 : i32 to vector<32x64xi32>
    %65 = arith.addi %54, %64 : vector<32x64xi32>
    %66 = arith.select %63, %65, %54 : vector<32x64xi1>, vector<32x64xi32>
    %c0_i32_11 = arith.constant 0 : i32
    %67 = vector.broadcast %c0_i32_11 : i32 to vector<32x64xi32>
    %68 = arith.cmpi sgt, %66, %67 : vector<32x64xi32>
    %c1_i32_12 = arith.constant 1 : i32
    %69 = tpu.dynamic_rotate %24 by %c1_i32_12 dim 0 : vector<32x64xf32>, i32 -> vector<32x64xf32>
    %cst_13 = arith.constant 0.000000e+00 : f32
    %70 = vector.broadcast %cst_13 : f32 to vector<32x64xf32>
    %71 = arith.select %68, %69, %70 : vector<32x64xi1>, vector<32x64xf32>
    %c15_i32 = arith.constant 15 : i32
    %72 = vector.broadcast %c15_i32 : i32 to vector<32x64xi32>
    %73 = arith.cmpi slt, %66, %72 : vector<32x64xi32>
    %c31_i32 = arith.constant 31 : i32
    %74 = tpu.dynamic_rotate %49 by %c31_i32 dim 0 : vector<32x64xf32>, i32 -> vector<32x64xf32>
    %cst_14 = arith.constant 0.000000e+00 : f32
    %75 = vector.broadcast %cst_14 : f32 to vector<32x64xf32>
    %76 = arith.select %73, %74, %75 : vector<32x64xi1>, vector<32x64xf32>
    %77 = arith.addf %38, %71 : vector<32x64xf32>
    %78 = arith.addf %77, %76 : vector<32x64xf32>
    %c0_15 = arith.constant 0 : index
    %c0_16 = arith.constant 0 : index
    %79 = vector.load %arg4[%c0_15, %c0_16] : memref<32x64xf32, #tpu.memory_space<vmem>>, vector<32x64xf32>
    tpu.vector_store %arg4[%c0_15, %c0_16], %78 {strides = array<i32>} : memref<32x64xf32, #tpu.memory_space<vmem>>, vector<32x64xf32>,
    return
  }
  func.func @transform_0(%arg0: i32) -> (i32, i32) {
    %c0_i32 = arith.constant 0 : i32
    %c0_i32_0 = arith.constant 0 : i32
    return %arg0, %c0_i32 : i32, i32
  }
  func.func @transform_1(%arg0: i32) -> (i32, i32) {
    %c0_i32 = arith.constant 0 : i32
    %c0_i32_0 = arith.constant 0 : i32
    %c0_i32_1 = arith.constant 0 : i32
    return %c0_i32, %c0_i32_0 : i32, i32
  }
  func.func @transform_2(%arg0: i32) -> (i32, i32) {
    %c0_i32 = arith.constant 0 : i32
    %c0_i32_0 = arith.constant 0 : i32
    %c0_i32_1 = arith.constant 0 : i32
    return %c0_i32, %c0_i32_0 : i32, i32
  }
  func.func @transform_3(%arg0: i32) -> (i32, i32) {
    %c0_i32 = arith.constant 0 : i32
    %c0_i32_0 = arith.constant 0 : i32
    return %arg0, %c0_i32 : i32, i32
  }
}

</mosaic_0001>

<bundles_post_ra>
// kernel: tpu_custom_call.1
= control target key start
LH: loop header
LB: loop body
LE: loop exit
PB: predicated region body
PF: predicated region fallthrough
CT: control target
= control target key end

     0   :  { %8 = vsyncpa [#allocation3], 0  ;;  %s658_s0 = inlined_call_operand.hbm [shape: f32[32,64], index: 0, kind: input, shape index: {}]   ;;  %s659_s1 = inlined_call_operand.hbm [shape: f32[9,64], index: 1, kind: input, shape index: {}]   ;;  %s660_s2 = inlined_call_operand.vmem [shape: f32[1,64], index: 2, kind: input, shape index: {}]   ;;  %s661_s3 = inlined_call_operand.hbm [shape: f32[32,64], index: 3, kind: output, shape index: {}]  }
   0x1   :  { %9 = vsyncpa [#allocation6], 0 }
   0x2   :  { %10 = vsyncpa [#allocation4], 0  ;;  %s425_s12 = smov [#allocation2]   ;;  %s353_s16 = scalar_lea.hbm %s658_s0, 512 }
   0x3   :  { %s16_s13 = sshll.u32 %s425_s12, 4  ;;  %p354_p0 = scmp.ne.s32.totalorder %s658_s0, %s353_s16  ;;  %s17_s13 = int_to_ptr.vmem [resolvable:$true] %s16_s13 }
   0x4   :  { %p357_p1 = scmp.lt.u32.totalorder %s353_s16, %s658_s0 }
   0x6   :  { %p359_p2 = pnand %p357_p1, %p354_p0 }
   0x8   :  { %362 = shalt.err (!%p359_p2)
}
   0x9   :  { %s363_s21 = scalar_lea.vmem %s17_s13, 512  ;;  %p368_p4 = scmp.lt.s32.totalorder %s17_s13, %s17_s13 }
   0xa   :  { %p364_p3 = scmp.ne.s32.totalorder %s17_s13, %s363_s21  ;;  %p369_p5 = scmp.lt.s32.totalorder %s363_s21, %s363_s21 }
   0xc   :  { %p370_p6 = por %p369_p5, %p368_p4 }
   0xe   :  { %p371_p7 = pnand %p370_p6, %p364_p3 }
  0x10   :  { %374 = shalt.err (!%p371_p7)
}
  0x11   :  { %s426_s22 = smov 128   ;;  %s427_s23 = smov 8  }
  0x12   :  { %22 = dma.hbm_to_vmem [thread:$0]  %s658_s0, 512, %s17_s13, [#allocation3], %s426_s22, %s426_s22, %s427_s23  }
  0x13   :  { %s428_s26 = smov [#allocation5]   ;;  %s375_s30 = scalar_lea.hbm %s659_s1, 256 }
  0x14   :  { %s28_s27 = sshll.u32 %s428_s26, 4  ;;  %p376_p8 = scmp.ne.s32.totalorder %s659_s1, %s375_s30  ;;  %s29_s27 = int_to_ptr.vmem [resolvable:$true] %s28_s27 }
  0x15   :  { %p379_p9 = scmp.lt.u32.totalorder %s375_s30, %s659_s1 }
  0x17   :  { %p381_p10 = pnand %p379_p9, %p376_p8 }
  0x19   :  { %384 = shalt.err (!%p381_p10)
}
  0x1a   :  { %s385_s8 = scalar_lea.vmem %s29_s27, 256  ;;  %p390_p12 = scmp.lt.s32.totalorder %s29_s27, %s29_s27 }
  0x1b   :  { %p386_p11 = scmp.ne.s32.totalorder %s29_s27, %s385_s8  ;;  %p391_p13 = scmp.lt.s32.totalorder %s385_s8, %s385_s8 }
  0x1d   :  { %p392_p0 = por %p391_p13, %p390_p12 }
  0x1f   :  { %p393_p1 = pnand %p392_p0, %p386_p11 }
  0x21   :  { %396 = shalt.err (!%p393_p1)
}
  0x22   :  { %34 = dma.hbm_to_vmem [thread:$0]  %s659_s1, 256, %s29_s27, [#allocation6], %s426_s22, %s426_s22, %s427_s23  }
  0x23   :  { %419 = dma.done.wait [#allocation3], 512  }
  0x24   :  { %420 = vsyncadd [#allocation3], 4294966784 }
  0x25   :  { %421 = dma.done.wait [#allocation6], 256  }
  0x26   :  { %422 = vsyncadd [#allocation6], 4294967040  ;;  %v483_v0 = vld [vmem:[#allocation2] sm:$0xff]  ;;  %v485_v1 = vld [vmem:[#allocation2 + $0x10] sm:$0xff]  ;;  %s429_s10 = smov 64   ;;  %vm53_vm0 = vcmask 1048064   ;;  %v50_v20 = vlaneseq }
  0x27   :  { %54 = vrot.lane.b32.xlu0 %v483_v0, %s429_s10  ;;  %60 = vrot.lane.b32.xlu1 %v485_v1, %s429_s10  ;;  %v489_v2 = vld [vmem:[#allocation2 + $0x8] sm:$0xff]  ;;  %v491_v3 = vld [vmem:[#allocation2 + $0x18] sm:$0xff]  ;;  %s430_s1 = smov 68   ;;  %s431_s11 = smov 124   ;;  %v47_v24 = vld [vmem:[#allocation5] sm:$0xff]  ;;  %vm320_vm8 = vcmask 523264  }
  0x28   :  { %v511_v21 = vshrl.u32 %v50_v20, 7  ;;  %v516_v26 = vand.u32 127, %v50_v20  ;;  %v343_v32 = vld [vmem:[%s660_s2] ss:$0 sm:$0xff]  ;;  %s432_s2 = smov [#allocation7]  }
  0x29   :  { %v153_v38 = vadd.f32 %v343_v32, %v483_v0  ;;  %v154_v41 = vadd.f32 %v343_v32, %v489_v2  ;;  %v155_v47 = vadd.f32 %v343_v32, %v485_v1  ;;  %v547_v54 = vadd.f32 %v343_v32, %v491_v3  ;;  %s330_s14 = sshll.u32 %s432_s2, 4  ;;  %s331_s14 = int_to_ptr.vmem [resolvable:$true] %s330_s14 }
  0x2a   :  { %v125_v22 = vsub.s32 1, %v511_v21  ;;  %v203_v23 = vsub.s32 7, %v511_v21  ;;  %v171_v25 = vsub.s32 4, %v511_v21  ;;  %v117_v27 = vsub.s32 0, %v511_v21  ;;  %s397_s15 = scalar_lea.vmem %s331_s14, 512  ;;  %p402_p3 = scmp.lt.s32.totalorder %s331_s14, %s331_s14 }
  0x2b   :  { %57 = vrot.lane.b32.xlu0 %v489_v2, %s429_s10  ;;  %63 = vrot.lane.b32.xlu1 %v491_v3, %s429_s10  ;;  %v159_v28 = vsub.s32 3, %v511_v21  ;;  %v195_v30 = vsub.s32 6, %v511_v21  ;;  %vm52_vm1 = vcmp.ge.s32.totalorder %v516_v26, 4  ;;  %v137_v42 = vsub.s32 2, %v511_v21  ;;  %p398_p2 = scmp.ne.s32.totalorder %s331_s14, %s397_s15  ;;  %p403_p4 = scmp.lt.s32.totalorder %s397_s15, %s397_s15 }
  0x2c   :  { %v126_v29 = vrot.slane %v47_v24, %v125_v22  ;;  %v204_v31 = vrot.slane %v47_v24, %v203_v23  ;;  %v172_v33 = vrot.slane %v47_v24, %v171_v25  ;;  %v118_v34 = vrot.slane %v47_v24, %v117_v27 }
  0x2d   :  { %v525_v35 = vrot.slane %v47_v24, %v159_v28  ;;  %v527_v36 = vrot.slane %v47_v24, %v195_v30  ;;  %v183_v43 = vsub.s32 5, %v511_v21  ;;  %v227_v52 = vadd.s32 8, %v511_v21  ;;  %p404_p5 = por %p403_p4, %p402_p3 }
  0x2e   :  { %v127_v37 = vmul.f32 %v126_v29, %v483_v0  ;;  %v205_v39 = vmul.f32 %v204_v31, %v483_v0  ;;  %v128_v40 = vmul.f32 %v126_v29, %v489_v2  ;;  %v206_v45 = vmul.f32 %v204_v31, %v489_v2 }
  0x2f   :  { %v129_v46 = vmul.f32 %v126_v29, %v485_v1  ;;  %v173_v48 = vmul.f32 %v172_v33, %v483_v0  ;;  %v207_v50 = vmul.f32 %v204_v31, %v485_v1  ;;  %v130_v51 = vmul.f32 %v126_v29, %v491_v3  ;;  %p405_p6 = pnand %p404_p5, %p398_p2 }
  0x30   :  { %v550_v55 = vmul.f32 %v204_v31, %v491_v3  ;;  %v228_v56 = vadd.s32 16, %v511_v21  ;;  %vm98_vm2 = vcmp.lt.s32.totalorder %v516_v26, 60  ;;  %v554_v57 = vrot.slane %v47_v24, %v137_v42 }
  0x31   :  { %v556_v58 = vrot.slane %v47_v24, %v183_v43  ;;  %v174_v59 = vmul.f32 %v172_v33, %v489_v2  ;;  %v175_v63 = vmul.f32 %v172_v33, %v485_v1  ;;  %v344_v24 = vld [vmem:[#allocation5 + $0x8] ss:$0 sm:$0xff]  ;;  %vm286_vm3 = vcmp.lt.s32.totalorder %v511_v21, 1 }
  0x32   :  { %vm303_vm4 = vcmp.lt.s32.totalorder %v511_v21, 7 }
  0x99   :  { %v55_v4 = vpop.permute.xlu0 %54  ;;  %v61_v5 = vpop.permute.xlu1 %60 }
  0x9a   :  { %v56_v6 = vsel %vm53_vm0, %v55_v4, %v483_v0  ;;  %v62_v7 = vsel %vm53_vm0, %v61_v5, %v485_v1  ;;  %v229_v4 = vadd.s32 24, %v511_v21 }
  0x9b   :  { %66 = vrot.lane.b32.xlu0 %v56_v6, %s429_s10 }
  0x9d   :  { %v58_v8 = vpop.permute.xlu0 %57  ;;  %v64_v9 = vpop.permute.xlu1 %63 }
  0x9e   :  { %v59_v10 = vsel %vm53_vm0, %v58_v8, %v489_v2  ;;  %v65_v11 = vsel %vm53_vm0, %v64_v9, %v491_v3  ;;  %v241_v8 = vand.u32 15, %v227_v52 }
  0x9f   :  { %70 = vrot.lane.b32.xlu0 %v62_v7, %s429_s10  ;;  %68 = vrot.lane.b32.xlu1 %v59_v10, %s429_s10 }
  0xa0   :  { %vm587_vm6 = vcmp.lt.s32.totalorder %v241_v8, 15 }
  0xa3   :  { %72 = vrot.lane.b32.xlu1 %v65_v11, %s429_s10  ;;  %v248_v11 = vand.u32 15, %v228_v56 }
  0xa5   :  { %vm583_vm5 = vcmp.gt.s32.totalorder %v248_v11, 0 }
 0x10d   :  { %v67_v12 = vpop.permute.xlu0 %66 }
 0x10e   :  { %v74_v13 = vsel %vm53_vm0, %v67_v12, %v483_v0  ;;  %v561_v0 = vmul.f32 %v172_v33, %v491_v3 }
 0x10f   :  { %82 = vrot.lane.b32.xlu0 %v74_v13, %s430_s1 }
 0x111   :  { %v69_v14 = vpop.permute.xlu1 %68  ;;  %v71_v15 = vpop.permute.xlu0 %70 }
 0x112   :  { %v75_v16 = vsel %vm53_vm0, %v69_v14, %v489_v2  ;;  %v76_v17 = vsel %vm53_vm0, %v71_v15, %v485_v1 }
 0x113   :  { %84 = vrot.lane.b32.xlu1 %v75_v16, %s430_s1  ;;  %86 = vrot.lane.b32.xlu0 %v76_v17, %s430_s1 }
 0x115   :  { %v73_v18 = vpop.permute.xlu1 %72 }
 0x116   :  { %v77_v19 = vsel %vm53_vm0, %v73_v18, %v491_v3 }
 0x117   :  { %88 = vrot.lane.b32.xlu1 %v77_v19, %s430_s1  ;;  %99 = vrot.lane.b32.xlu0 %v74_v13, %s431_s11  ;;  %v234_v13 = vand.u32 15, %v511_v21 }
 0x119   :  { %vm598_vm7 = vcmp.gt.s32.totalorder %v234_v13, 0 }
 0x11b   :  { %101 = vrot.lane.b32.xlu1 %v75_v16, %s431_s11  ;;  %103 = vrot.lane.b32.xlu0 %v76_v17, %s431_s11 }
 0x11f   :  { %105 = vrot.lane.b32.xlu1 %v77_v19, %s431_s11  ;;  %v255_v19 = vand.u32 15, %v229_v4 }
 0x121   :  { %vm605_vm9 = vcmp.lt.s32.totalorder %v255_v19, 15 }
 0x181   :  { %v83_v44 = vpop.permute.xlu0 %82 }
 0x182   :  { %v94_v49 = vsel %vm52_vm1, %v83_v44, 0.0 }
 0x183   :  { %v161_v53 = vmul.f32 %v525_v35, %v94_v49  ;;  %v119_v60 = vmul.f32 %v118_v34, %v94_v49  ;;  %v197_v5 = vmul.f32 %v527_v36, %v94_v49 }
 0x185   :  { %v85_v61 = vpop.permute.xlu1 %84  ;;  %v87_v62 = vpop.permute.xlu0 %86  ;;  %v165_v2 = vadd.f32 %v161_v53, %v153_v38  ;;  %v131_v14 = vadd.f32 %v127_v37, %v119_v60  ;;  %v209_v20 = vadd.f32 %v205_v39, %v197_v5 }
 0x186   :  { %v95_v6 = vsel %vm52_vm1, %v85_v61, 0.0  ;;  %v96_v7 = vsel %vm52_vm1, %v87_v62, 0.0 }
 0x187   :  { %v120_v9 = vmul.f32 %v118_v34, %v95_v6  ;;  %v162_v10 = vmul.f32 %v525_v35, %v95_v6  ;;  %v198_v1 = vmul.f32 %v527_v36, %v95_v6  ;;  %v121_v3 = vmul.f32 %v118_v34, %v96_v7 }
 0x188   :  { %v163_v12 = vmul.f32 %v525_v35, %v96_v7  ;;  %v199_v16 = vmul.f32 %v527_v36, %v96_v7  ;;  %v177_v30 = vadd.f32 %v173_v48, %v165_v2 }
 0x189   :  { %v166_v15 = vadd.f32 %v162_v10, %v154_v41  ;;  %v89_v17 = vpop.permute.xlu1 %88  ;;  %v100_v18 = vpop.permute.xlu0 %99  ;;  %v132_v27 = vadd.f32 %v128_v40, %v120_v9  ;;  %v210_v31 = vadd.f32 %v206_v45, %v198_v1  ;;  %v133_v32 = vadd.f32 %v129_v46, %v121_v3 }
 0x18a   :  { %v167_v22 = vadd.f32 %v163_v12, %v155_v47  ;;  %v97_v23 = vsel %vm52_vm1, %v89_v17, 0.0  ;;  %v111_v25 = vsel %vm98_vm2, %v100_v18, 0.0 }
 0x18b   :  { %v122_v28 = vmul.f32 %v118_v34, %v97_v23  ;;  %v139_v29 = vmul.f32 %v554_v57, %v111_v25  ;;  %v164_v33 = vmul.f32 %v525_v35, %v97_v23  ;;  %v200_v37 = vmul.f32 %v527_v36, %v97_v23 }
 0x18c   :  { %v211_v34 = vadd.f32 %v207_v50, %v199_v16  ;;  %v185_v40 = vmul.f32 %v556_v58, %v111_v25  ;;  %v217_v41 = vmul.f32 %v344_v24, %v111_v25  ;;  %v178_v42 = vadd.f32 %v174_v59, %v166_v15 }
 0x18d   :  { %v102_v43 = vpop.permute.xlu1 %101  ;;  %v104_v44 = vpop.permute.xlu0 %103  ;;  %v143_v45 = vadd.f32 %v139_v29, %v131_v14  ;;  %v179_v36 = vadd.f32 %v175_v63, %v167_v22  ;;  %v134_v47 = vadd.f32 %v130_v51, %v122_v28  ;;  %v168_v53 = vadd.f32 %v164_v33, %v547_v54 }
 0x18e   :  { %v112_v35 = vsel %vm98_vm2, %v102_v43, 0.0  ;;  %v113_v46 = vsel %vm98_vm2, %v104_v44, 0.0  ;;  %v212_v56 = vadd.f32 %v550_v55, %v200_v37  ;;  %v221_v51 = vadd.f32 %v217_v41, %v209_v20 }
 0x18f   :  { %v140_v48 = vmul.f32 %v554_v57, %v112_v35  ;;  %v186_v49 = vmul.f32 %v556_v58, %v112_v35  ;;  %v218_v50 = vmul.f32 %v344_v24, %v112_v35  ;;  %v141_v59 = vmul.f32 %v554_v57, %v113_v46 }
 0x190   :  { %v219_v60 = vmul.f32 %v344_v24, %v113_v46  ;;  %v187_v4 = vmul.f32 %v556_v58, %v113_v46  ;;  %v282_v6 = vrot.slane %v143_v45, 7  ;;  %v180_v15 = vadd.f32 %v561_v0, %v168_v53 }
 0x191   :  { %v144_v62 = vadd.f32 %v140_v48, %v132_v27  ;;  %v222_v63 = vadd.f32 %v218_v50, %v210_v31  ;;  %v106_v5 = vpop.permute.xlu1 %105  ;;  %v145_v7 = vadd.f32 %v141_v59, %v133_v32  ;;  %v190_v55 = vadd.f32 %v186_v49, %v178_v42 }
 0x192   :  { %v223_v8 = vadd.f32 %v219_v60, %v211_v34  ;;  %v114_v54 = vsel %vm98_vm2, %v106_v5, 0.0  ;;  %v191_v14 = vadd.f32 %v187_v4, %v179_v36  ;;  %v299_v19 = vrot.slane %v221_v51, 1 }
 0x193   :  { %v283_v2 = vrot.slane %v144_v62, 7  ;;  %v300_v9 = vrot.slane %v222_v63, 1  ;;  %v142_v10 = vmul.f32 %v554_v57, %v114_v54  ;;  %v284_v11 = vrot.slane %v145_v7, 7 }
 0x194   :  { %v301_v1 = vrot.slane %v223_v8, 1  ;;  %v188_v3 = vmul.f32 %v556_v58, %v114_v54  ;;  %v220_v12 = vmul.f32 %v344_v24, %v114_v54  ;;  %v189_v27 = vadd.f32 %v185_v40, %v177_v30 }
 0x195   :  { %v289_v13 = vsel %vm286_vm3, %v282_v6, %v283_v2  ;;  %v146_v16 = vadd.f32 %v142_v10, %v134_v47  ;;  %v288_v26 = vsel %vm286_vm3, %v283_v2, %v284_v11  ;;  %v306_v34 = vsel %vm303_vm4, %v299_v19, %v300_v9 }
 0x196   :  { %v313_v17 = vadd.f32 %v289_v13, %v190_v55  ;;  %v305_v18 = vsel %vm303_vm4, %v300_v9, %v301_v1  ;;  %v224_v57 = vadd.f32 %v220_v12, %v212_v56  ;;  %v293_v58 = vsel %vm583_vm5, %v288_v26, 0.0 }
 0x197   :  { %v309_v20 = vsel %vm587_vm6, %v305_v18, 0.0  ;;  %v285_v22 = vrot.slane %v146_v16, 7  ;;  %v314_v23 = vadd.f32 %v293_v58, %v191_v14  ;;  %v192_v0 = vadd.f32 %v188_v3, %v180_v15 }
 0x198   :  { %v317_v24 = vadd.f32 %v313_v17, %v309_v20  ;;  %v302_v25 = vrot.slane %v224_v57, 1 }
 0x199   :  { %v287_v28 = vsel %vm286_vm3, %v284_v11, %v285_v22  ;;  %v290_v29 = vsel %vm286_vm3, %v285_v22, %v282_v6 }
 0x19a   :  { %v291_v31 = vsel %vm598_vm7, %v290_v29, 0.0  ;;  %v304_v32 = vsel %vm303_vm4, %v301_v1, %v302_v25  ;;  %v307_v33 = vsel %vm303_vm4, %v302_v25, %v299_v19  ;;  %v315_v37 = vadd.f32 %v287_v28, %v192_v0  ;;  %322 = vst.msk [vmem:[#allocation7 + $0x8] sm:$0xff] %vm320_vm8, %v317_v24 }
 0x19b   :  { %v311_v30 = vsel %vm605_vm9, %v307_v33, 0.0  ;;  %v312_v38 = vadd.f32 %v291_v31, %v189_v27  ;;  %v318_v39 = vadd.f32 %v314_v23, %v304_v32 }
 0x19c   :  { %v319_v40 = vadd.f32 %v315_v37, %v311_v30 }
 0x19d   :  { %v316_v41 = vadd.f32 %v312_v38, %v306_v34  ;;  %323 = vst.msk [vmem:[#allocation7 + $0x10] sm:$0xff] %vm320_vm8, %v318_v39 }
 0x19e   :  { %324 = vst.msk [vmem:[#allocation7 + $0x18] sm:$0xff] %vm320_vm8, %v319_v40 }
 0x19f   :  { %321 = vst.msk [vmem:[#allocation7] sm:$0xff] %vm320_vm8, %v316_v41 }
 0x1a0   :  { %408 = shalt.err (!%p405_p6)
}
 0x1a1   :  { %s409_s18 = scalar_lea.hbm %s661_s3, 512 }
 0x1a2   :  { %p410_p7 = scmp.ne.s32.totalorder %s661_s3, %s409_s18  ;;  %p413_p8 = scmp.lt.u32.totalorder %s409_s18, %s661_s3 }
 0x1a4   :  { %p415_p9 = pnand %p413_p8, %p410_p7 }
 0x1a6   :  { %418 = shalt.err (!%p415_p9)
}
 0x1a7   :  { %336 = dma.vmem_to_hbm [thread:$0]  %s331_s14, 512, %s661_s3, [#allocation4], %s426_s22, %s426_s22, %s427_s23  }
 0x1a8   :  { %423 = dma.done.wait [#allocation4], 512  }
 0x1a9   :  { %424 = vsyncadd [#allocation4], 4294966784 }
 0x1aa   :  { %340 = vsyncpa [#allocation3], 1 }
 0x1ab   :  { %341 = vsyncpa [#allocation6], 1 }
 0x1ac   :  { %342 = vsyncpa [#allocation4], 1 }

</bundles_post_ra>
